<compile_context>
chip_gen: v5e
topology: v5e:2x2
jax: 0.10.0
libtpu: 0.0.40
codegen_flags: <defaults>
</compile_context>

<pallas_src>
import math

import jax
import jax.numpy as jnp
from jax.experimental import pallas as pl
from jax.experimental.pallas import tpu as pltpu


def _rowsum_kernel(logp_ref, rowsum_ref):
    """grid = (batch_blocks, vocab_blocks); vocab (reduction) axis innermost.

    Accumulates sum_c logp[b, c] directly into the resident (tb, 1) f32 output
    block (same output block index across the reduction axis => stays in VMEM).
    """
    j = pl.program_id(1)

    @pl.when(j == 0)
    def _():
        rowsum_ref[...] = jnp.zeros_like(rowsum_ref)

    # Pure row-sum: 1 load + 1 add per element; the lane reduce rides the XLU.
    rowsum_ref[...] += jnp.sum(
        logp_ref[...].astype(jnp.float32), axis=-1, keepdims=True)


def _pick_tile(full, want, align):
    """Largest multiple of `align` that divides `full` and is <= max(want, align).
    `full` must already be a multiple of `align` (caller pads)."""
    t = min(full, max(align, (want // align) * align))
    while full % t:
        t -= align
    return t


def label_smoothing_loss(output, target, *, label_smoothing, tgt_vocab_size,
                         ignore_index, batch_tile=256, vocab_tile=4096):
    """output: (B, V) float log-probs (f32 or bf16); target: (B,) int. -> f32 scalar."""
    assert 0.0 < label_smoothing <= 1.0
    assert tgt_vocab_size > 2
    b, v = output.shape
    assert v == tgt_vocab_size

    smoothing_value = label_smoothing / (tgt_vocab_size - 2)
    confidence = 1.0 - label_smoothing
    log_sv = math.log(smoothing_value)
    c_conf = confidence * math.log(confidence) if confidence > 0.0 else 0.0
    entropy_const = c_conf + label_smoothing * log_sv
    # Column that the buffer write `one_hot[ignore_index] = 0` zeroes (torch
    # negative indexing wraps); the *row* mask compares the raw ignore_index.
    col_pad = ignore_index % v

    # ---- pad to (8, 128) alignment instead of falling back to untiled blocks.
    b_pad = -(-b // 8) * 8
    v_pad = -(-v // 128) * 128
    out_p = output
    if (b_pad, v_pad) != (b, v):
        # Zero-padded log-prob columns/rows contribute exactly 0 to the row sum;
        # padded rows are dropped before the epilogue.
        out_p = jnp.pad(output, ((0, b_pad - b), (0, v_pad - v)))

    tb = _pick_tile(b_pad, batch_tile, 8)
    if b_pad // tb < 2 and b_pad >= 16:        # keep >=2 batch blocks (v7x megacore)
        tb = _pick_tile(b_pad, b_pad // 2, 8)
    tv = _pick_tile(v_pad, vocab_tile, 128)
    nb, nv = b_pad // tb, v_pad // tv

    itemsize = jnp.dtype(out_p.dtype).itemsize
    in_bytes = 2 * tb * tv * itemsize          # double-buffered log-prob block
    vmem_limit = int(max(in_bytes + (8 << 20), 32 << 20))

    rowsum = pl.pallas_call(
        _rowsum_kernel,
        out_shape=jax.ShapeDtypeStruct((b_pad, 1), jnp.float32),
        grid_spec=pltpu.PrefetchScalarGridSpec(
            num_scalar_prefetch=0,
            grid=(nb, nv),                                    # reduction axis last
            in_specs=[pl.BlockSpec((tb, tv), lambda i, j: (i, j))],
            out_specs=pl.BlockSpec((tb, 1), lambda i, j: (i, 0)),
        ),
        compiler_params=pltpu.CompilerParams(
            dimension_semantics=("parallel", "arbitrary"),
            vmem_limit_bytes=vmem_limit),
    )(out_p)

    # ---- O(B) epilogue in plain JAX (negligible traffic).
    rowsum = rowsum[:b, 0]                                    # (B,)
    tgt = target.astype(jnp.int32)
    tgt_safe = jnp.clip(tgt, 0, v - 1)
    logp_tgt = jnp.take_along_axis(output, tgt_safe[:, None], axis=1)[:, 0]
    logp_tgt = logp_tgt.astype(jnp.float32)                   # (B,)
    logp_pad = output[:, col_pad].astype(jnp.float32)         # (B,)

    sv = jnp.float32(smoothing_value)
    # Rare corner: target lands exactly on the (wrapped) padding column while
    # the row is not masked; the scatter then overwrites the zeroed column.
    alias = (tgt == col_pad) & (tgt != ignore_index)
    pad_term = jnp.where(alias, sv * jnp.float32(log_sv), sv * logp_pad)
    row_loss = (jnp.float32(entropy_const)
                - sv * rowsum
                - jnp.float32(confidence - smoothing_value) * logp_tgt
                + pad_term)
    return jnp.sum(jnp.where(tgt == ignore_index, 0.0, row_loss))


def _reference(output, target, *, label_smoothing, tgt_vocab_size, ignore_index):
    """Pure-JAX mirror of the PyTorch module (explicit model_prob + kl_div sum)."""
    sv = label_smoothing / (tgt_vocab_size - 2)
    conf = 1.0 - label_smoothing
    b, v = output.shape
    col_pad = ignore_index % v
    col = jnp.arange(v)[None, :]
    tgt = target[:, None]
    p = jnp.full((b, v), sv, jnp.float32)
    p = jnp.where(col == col_pad, 0.0, p)
    p = jnp.where(col == tgt, conf, p)
    p = jnp.where(tgt == ignore_index, 0.0, p)
    safe = jnp.where(p > 0, p, 1.0)
    return jnp.sum(jnp.where(p > 0,
                             p * (jnp.log(safe) - output.astype(jnp.float32)),
                             0.0))


if __name__ == "__main__":
    key = jax.random.PRNGKey(0)
    label_smoothing = 0.1
    ignore_index = 1  # padding token index

    # Case 1: aligned shapes, f32, small tiles to exercise the (batch, vocab) grid.
    B, V = 64, 1024
    k1, k2 = jax.random.split(key)
    logits = jax.random.normal(k1, (B, V), dtype=jnp.float32)
    output = jax.nn.log_softmax(logits, axis=-1)              # model log-probs
    target = jax.random.randint(k2, (B,), 0, V, dtype=jnp.int32)
    target = target.at[3].set(ignore_index).at[17].set(ignore_index)  # padded rows

    loss = label_smoothing_loss(
        output, target, label_smoothing=label_smoothing,
        tgt_vocab_size=V, ignore_index=ignore_index,
        batch_tile=16, vocab_tile=256)
    loss = jax.block_until_ready(loss)
    ref = _reference(output, target, label_smoothing=label_smoothing,
                     tgt_vocab_size=V, ignore_index=ignore_index)
    assert jnp.allclose(loss, ref, rtol=1e-4, atol=1e-2), (loss, ref)

    # Case 2: non-aligned shapes (exercise batch/vocab zero-padding) + bf16 log-probs.
    B2, V2 = 37, 1000
    k3, k4 = jax.random.split(k2)
    logits2 = jax.random.normal(k3, (B2, V2), dtype=jnp.float32)
    output2 = jax.nn.log_softmax(logits2, axis=-1).astype(jnp.bfloat16)
    target2 = jax.random.randint(k4, (B2,), 0, V2, dtype=jnp.int32)
    target2 = target2.at[0].set(ignore_index)

    loss2 = label_smoothing_loss(
        output2, target2, label_smoothing=label_smoothing,
        tgt_vocab_size=V2, ignore_index=ignore_index,
        batch_tile=16, vocab_tile=256)
    loss2 = jax.block_until_ready(loss2)
    ref2 = _reference(output2, target2, label_smoothing=label_smoothing,
                      tgt_vocab_size=V2, ignore_index=ignore_index)
    assert jnp.allclose(loss2, ref2, rtol=5e-3, atol=5e-2), (loss2, ref2)

    print("KERNEL_OK")
</pallas_src>

<mosaic_0001>
module attributes {stable_mosaic.version = 11 : i64} {
  func.func @_rowsum_kernel(%arg0: i32, %arg1: i32, %arg2: memref<16x256xf32, #tpu.memory_space<vmem>>, %arg3: memref<16x1xf32, #tpu.memory_space<vmem>>) attributes {dimension_semantics = [#tpu.dimension_semantics<parallel>, #tpu.dimension_semantics<arbitrary>], iteration_bounds = array<i64: 4, 4>, scalar_prefetch = 0 : i64, scratch_operands = 0 : i64, tpu.core_type = #tpu.core_type<tc>, window_params = [{transform_indices = @transform_0, window_bounds = array<i64: 16, 256>}, {transform_indices = @transform_1, window_bounds = array<i64: 16, 1>}]} {
    %c0_i32 = arith.constant 0 : i32
    %0 = arith.cmpi eq, %arg1, %c0_i32 : i32
    %1 = arith.extui %0 : i1 to i32
    %c0_i32_0 = arith.constant 0 : i32
    %2 = arith.cmpi ne, %1, %c0_i32_0 : i32
    scf.if %2 {
      %cst_6 = arith.constant 0.000000e+00 : f32
      %9 = vector.broadcast %cst_6 : f32 to vector<16x1xf32>
      %c0_7 = arith.constant 0 : index
      %c0_8 = arith.constant 0 : index
      %10 = vector.load %arg3[%c0_7, %c0_8] : memref<16x1xf32, #tpu.memory_space<vmem>>, vector<16x1xf32>
      tpu.vector_store %arg3[%c0_7, %c0_8], %9 {strides = array<i32>} : memref<16x1xf32, #tpu.memory_space<vmem>>, vector<16x1xf32>,
    } else {
    }
    %c0 = arith.constant 0 : index
    %c0_1 = arith.constant 0 : index
    %3 = vector.load %arg3[%c0, %c0_1] : memref<16x1xf32, #tpu.memory_space<vmem>>, vector<16x1xf32>
    %c0_2 = arith.constant 0 : index
    %c0_3 = arith.constant 0 : index
    %4 = vector.load %arg2[%c0_2, %c0_3] : memref<16x256xf32, #tpu.memory_space<vmem>>, vector<16x256xf32>
    %cst = arith.constant dense<0.000000e+00> : vector<16xf32>
    %5 = vector.multi_reduction <add>, %4, %cst [1] : vector<16x256xf32> to vector<16xf32>
    %6 = vector.shape_cast %5 : vector<16xf32> to vector<16x1xf32>
    %7 = arith.addf %3, %6 : vector<16x1xf32>
    %c0_4 = arith.constant 0 : index
    %c0_5 = arith.constant 0 : index
    %8 = vector.load %arg3[%c0_4, %c0_5] : memref<16x1xf32, #tpu.memory_space<vmem>>, vector<16x1xf32>
    tpu.vector_store %arg3[%c0_4, %c0_5], %7 {strides = array<i32>} : memref<16x1xf32, #tpu.memory_space<vmem>>, vector<16x1xf32>,
    return
  }
  func.func @transform_0(%arg0: i32, %arg1: i32) -> (i32, i32) {
    %c0_i32 = arith.constant 0 : i32
    return %arg0, %arg1 : i32, i32
  }
  func.func @transform_1(%arg0: i32, %arg1: i32) -> (i32, i32) {
    %c0_i32 = arith.constant 0 : i32
    %c0_i32_0 = arith.constant 0 : i32
    return %arg0, %c0_i32 : i32, i32
  }
}

</mosaic_0001>

<bundles_post_ra>
// kernel: tpu_custom_call.1
= control target key start
LH: loop header
LB: loop body
LE: loop exit
PB: predicated region body
PF: predicated region fallthrough
CT: control target
= control target key end

     0   :  { %6 = vsyncpa [#allocation3], 0  ;;  %s582_s0 = inlined_call_operand.hbm [shape: f32[64,1024], index: 0, kind: input, shape index: {}]   ;;  %s583_s1 = inlined_call_operand.vmem [shape: f32[64,1], index: 1, kind: output, shape index: {}]  }
   0x1   :  { %8 = vsyncpa [#allocation3 + $0x1], 0  ;;  %s469_s6 = smov 0   ;;  %s471_s7 = smov 0  }
   0x2   :  { %s473_s8 = smov 0   ;;  %s475_s9 = smov 0  }
   0x3   :  { %s477_s10 = smov 0   ;;  %s479_s11 = smov 0  }
   0x4   :  { %s481_s12 = smov 0   ;;  %s483_s13 = smov 0  }
   0x5 LB: > { %s265_s14 = sadd.s32 4294967295, %s453_s13   ;;  %s23_s15 = sadd.s32 1, %s445_s11  ;;  %s453_s13 = sphi %s483_s13, %s14_s13   ;;  %s449_s12 = sphi %s481_s12, %s592_s12   ;;  %s445_s11 = sphi %s479_s11, %s591_s11   ;;  %s441_s10 = sphi %s477_s10, %s590_s10   ;;  %s437_s9 = sphi %s475_s9, %s589_s9   ;;  %s433_s8 = sphi %s473_s8, %s588_s8   ;;  %s429_s7 = sphi %s471_s7, %s587_s7   ;;  %s425_s6 = sphi %s469_s6, %s586_s6  }
   0x6   : > { %p24_p0 = scmp.ge.s32.totalorder %s23_s15, 4  ;;  %s26_s16 = sadd.s32 1, %s449_s12 }
   0x7   : > { %s35_s17 = sadd.s32 1, %s433_s8  ;;  %p42_p1 = scmp.ne.s32.totalorder %s433_s8, %s429_s7 }
   0x8   : > { %s594_s15 = smov (%p24_p0, %s23_s15), 0  ;;  %s596_s16 = smov (!%p24_p0, %s26_s16), %s449_s12 }
   0x9   : > { %s31_s18 = ssub.s32 %s445_s11, %s594_s15  ;;  %p43_p2 = scmp.eq.s32.totalorder %s453_s13, 0 }
   0xa   : > { %p28_p3 = scmp.ge.s32.totalorder %s596_s16, 4  ;;  %p48_p4 = scmp.ne.s32.totalorder %s429_s7, %s425_s6 }
   0xb   : > { %p520_p5 = por %p43_p2, %p42_p1  ;;  %p49_p6 = scmp.eq.s32.totalorder %s265_s14, 0 }
   0xc   : > { %s598_s16 = smov (%p28_p3, %s596_s16), 0  ;;  %p288_p8 = scmp.lt.s32.totalorder %s453_s13, 16 }
   0xd   : > { %p526_p7 = por %p49_p6, %p48_p4  ;;  %s30_s21 = ssub.s32 %s449_s12, %s598_s16 }
   0xe   : > { %s32_s22 = sor.u32 %s31_s18, %s30_s21  ;;  %s98_s23 = sand.u32 1, %s433_s8  }
   0xf   : > { %p33_p9 = scmp.eq.s32.totalorder %s32_s22, 0  ;;  %s269_s24 = sshll.u32 %s98_s23, 5 }
  0x10   : > { %s271_s25 = sshll.u32 %s445_s11, 1  ;;  %s281_s27 = sshll.u32 %s449_s12, 4 }
  0x11   : > { %s536_s26 = scalar_select %p33_p9, %s433_s8, %s35_s17  }
  0x12   : > { %s108_s28 = sadd.s32 %s281_s27, %s271_s25  ;;  %s102_s29 = scalar_lea.vmem [#allocation2], %s269_s24 }
  0x13   : > { %s113_s30 = sshll.u32 %s102_s29, 4  ;;  %s273_s2 = sshll.u32 %s108_s28, 3  ;;  %s114_s30 = int_to_ptr.vmem [resolvable:$true] %s113_s30 }
  0x14   : > { %s110_s5 = scalar_lea.hbm %s582_s0, %s273_s2  ;;  %p285_p10 = pnand %p288_p8, %p520_p5 }
  0x15   : > { %s111_s6 = sshll.u32 %s110_s5, 4  ;;  %s99_s14 = scalar_lea.sflag [#allocation3], %s98_s23  ;;  %s112_s6 = int_to_ptr.hbm [resolvable:$true] %s111_s6 }
  0x16   : > { %s455_s17 = smov 1024   ;;  %s456_s18 = smov 256  }
  0x17   : > { %s457_s21 = smov 16   ;;  %p274_p11 = scmp.ge.s32.totalorder %s453_s13, 1 }
  0x18   : > { %287 = dma.hbm_to_vmem [thread:$0]  (!%p285_p10), %s112_s6, 512, %s114_s30, %s99_s14, %s455_s17, %s456_s18, %s457_s21  }
  0x19   : > { %p121_p12 = scmp.lt.s32.totalorder %s453_s13, 17 }
  0x1b   : > { %p122_p13 = pnand %p274_p11, %p121_p12 }
  0x1c   : > { %s127_s22 = sand.u32 (!%p122_p13), 1, %s429_s7  }
  0x1d   : > { %125 = sbr.rel (%p122_p13) target bundleno = 175 (0xaf), region = 24  ;;  %s275_s24 = sshll.u32 (!%p122_p13), %s127_s22, 5 }
  0x1e   : > { %s128_s25 = scalar_lea.sflag (!%p122_p13), [#allocation3], %s127_s22  ;;  %s131_s27 = scalar_lea.vmem (!%p122_p13), [#allocation2], %s275_s24 }
  0x22   : > { %420 = dma.done.wait (%p526_p7), %s128_s25, 512  }
  0x23   : > { %422 = vsyncadd (%p526_p7), %s128_s25, 4294966784  ;;  %s276_s19 = sshll.u32 %s441_s10, 1  ;;  %p278_p1 = scmp.ne.s32.totalorder %s437_s9, 0 }
  0x24   : > { %p154_p0 = scmp.lt.s32.totalorder %s276_s19, 7 }
  0x25   : > { %162 = sbr.rel (%p278_p1) target bundleno = 45 (0x2d), region = 32 }
  0x26   : > { %s600_s19 = smov (!%p154_p0, %s276_s19), 7 }
  0x27   : > { %s277_s23 = sshll.u32 %s600_s19, 3 }
  0x28   : > { %s157_s30 = scalar_lea.vmem %s583_s1, %s277_s23 }
  0x2a   : > { %vm163_vm0 = vcmask 7168   ;;  %v458_v0 = vmov 0.0  }
  0x2b   : > { %164 = vst.msk [vmem:[%s157_s30] sm:$0xff] %vm163_vm0, %v458_v0 }
  0x2c   : > { %165 = vst.msk [vmem:[%s157_s30 + $0x8] sm:$0xff] %vm163_vm0, %v458_v0 }
  0x2d PF: > { %v168_v1 = vld [vmem:[%s131_s27] sm:$0xff]  ;;  %v169_v2 = vld [vmem:[%s131_s27 + $0x8] sm:$0xff]  ;;  %v170_v4 = vld [vmem:[%s131_s27 + $0x10] sm:$0xff]  ;;  %vm180_vm1 = vcmask 7168  }
  0x2e   : > { %v172_v3 = vadd.f32 %v169_v2, %v168_v1  ;;  %v171_v5 = vld [vmem:[%s131_s27 + $0x18] sm:$0xff] }
  0x2f   : > { %v175_v6 = vadd.f32 %v171_v5, %v170_v4 }
  0x30   : > { %173 = vadd.xlane.f32.xlu0 %v172_v3 }
  0x32   : > { %v166_v7 = vld [vmem:[%s157_s30] sm:$0xff] }
  0x33   : > { %v167_v9 = vld [vmem:[%s157_s30 + $0x8] sm:$0xff] }
  0x38   : > { %176 = vadd.xlane.f32.xlu0 %v175_v6 }
  0xa3   : > { %v174_v8 = vpop.xlane.xlu0 %173 }
  0xa4   : > { %v178_v10 = vadd.f32 %v174_v8, %v166_v7 }
  0xa6   : > { %181 = vst.msk [vmem:[%s157_s30] sm:$0xff] %vm180_vm1, %v178_v10 }
  0xab   : > { %v177_v11 = vpop.xlane.xlu0 %176 }
  0xac   : > { %v179_v12 = vadd.f32 %v177_v11, %v167_v9 }
  0xae   : > { %182 = vst.msk [vmem:[%s157_s30 + $0x8] sm:$0xff] %vm180_vm1, %v179_v12 }
  0xaf PF: > { %s14_s13 = sadd.s32 1, %s453_s13   ;;  %s586_s6 = smov %s429_s7 }
  0xb0   : > { %p11_p2 = scmp.ge.s32.totalorder %s14_s13, 18   ;;  %s587_s7 = smov %s433_s8 }
  0xb1   : > { %s588_s8 = smov %s536_s26  ;;  %s589_s9 = smov %s445_s11 }
  0xb2   : > { %s590_s10 = smov %s449_s12  ;;  %s591_s11 = smov %s594_s15 }
  0xb3   : > { %s592_s12 = smov %s598_s16  ;;  %13 = sbr.rel (!%p11_p2) target bundleno = 5 (0x5), region = 68 }
  0xb8   :  { %205 = vsyncpa [#allocation3], 1 }
  0xb9   :  { %207 = vsyncpa [#allocation3 + $0x1], 1 }

</bundles_post_ra>
